<compile_context>
chip_gen: v5e
topology: v5e:2x2
jax: 0.10.0
libtpu: 0.0.40
codegen_flags: <defaults>
</compile_context>

<pallas_src>
import jax
import jax.numpy as jnp
from jax import lax
from jax.experimental import pallas as pl
from jax.experimental.pallas import tpu as pltpu


def _cdiv(a: int, b: int) -> int:
    return (a + b - 1) // b


def _round_down(x: int, m: int) -> int:
    return (x // m) * m


def _chip_kind() -> str:
    try:
        return jax.devices()[0].device_kind.lower()
    except Exception:  # pragma: no cover - detection is best-effort only
        return ""


def _make_mse_kernel(tm: int, w: int, total_rows: int, tiles_per_split: int,
                     need_mask: bool, fold: bool):
    """Weighted-SSE partial-sum kernel over (tm, w) row tiles.

    Accumulates w*(p-t)^2 into a small f32 VMEM scratch (pure VALU adds); the
    expensive cross-lane reduce + SMEM scalar store happens once per core
    split.  When `need_mask`, rows whose global index >= total_rows (the
    ragged tail / fully-out-of-range tiles) are zeroed before accumulation.
    """

    def kernel(pred_ref, target_ref, w_ref, out_ref, acc_ref):
        j = pl.program_id(1)

        @pl.when(j == 0)
        def _():
            acc_ref[...] = jnp.zeros_like(acc_ref)

        p = pred_ref[...].astype(jnp.float32)
        t = target_ref[...].astype(jnp.float32)
        wts = w_ref[...].astype(jnp.float32)
        diff = p - t
        contrib = wts * diff * diff                      # (tm, w), VPU only

        if need_mask:
            # Static total_rows; only the globally-last (partial) tile and any
            # fully-out-of-range tiles get anything masked.  Cheap VPU select.
            tile = pl.program_id(0) * tiles_per_split + j
            base = tile * tm
            row = lax.broadcasted_iota(jnp.int32, (tm, w), 0)
            contrib = jnp.where(row < (total_rows - base), contrib, 0.0)

        if fold:
            # Fold tm rows onto 8 sublanes: reshape splits the second-minor
            # axis (layout-compatible), sum(axis=0) is plain vreg adds (no XLU).
            acc_ref[...] += contrib.reshape(tm // 8, 8, w).sum(axis=0)
        else:
            # Tiny-input path (tm < 8): single small sublane reduce per step.
            acc_ref[...] += jnp.sum(contrib, axis=0, keepdims=True)

        @pl.when(j == pl.num_programs(1) - 1)
        def _():
            # Single expensive full reduce per core split, written once to SMEM.
            out_ref[0, 0] = jnp.sum(acc_ref[...])

    return kernel


def custom_mse_loss(pred, target, ray_weights, loss_weight: float = 1.0,
                    tile_bytes_per_input: int | None = None,
                    num_core_splits: int | None = None):
    """Pallas implementation of CustomMSELoss.forward (returns a scalar f32)."""
    assert pred.shape == target.shape == ray_weights.shape
    shape = pred.shape
    D = int(shape[-1])
    M = 1
    for s in shape[:-1]:
        M *= int(s)
    M = max(M, 1)
    N = M * D

    itemsize = jnp.dtype(pred.dtype).itemsize
    kind = _chip_kind()
    is_v7 = ("v7" in kind) or ("7x" in kind)

    # Generation-dependent defaults: v7x has 2 TensorCores and ~2.3x the HBM
    # bandwidth of v6e, so use bigger tiles + both cores there.  v5e/v6e are
    # single-TC: the core-split axis would only add overhead.
    if num_core_splits is None:
        num_core_splits = 2 if is_v7 else 1
    if tile_bytes_per_input is None:
        tile_bytes_per_input = (2 << 20) if is_v7 else (1 << 20)

    # Lane-dense repacking: the loss is a full sum (divided by M afterwards),
    # so if the flat element count is 128-aligned we can tile a (R, 128) slab
    # instead of (M, D).  The reshape of a contiguous buffer is a free bitcast.
    if N % 128 == 0:
        R, W = N // 128, 128
    else:
        # TODO(synk): for D that is huge AND not 128-aligned, add a second
        # lane-block grid axis; not needed for the shapes this module sees.
        R, W = M, D

    def prep(x):
        return x.reshape(R, W)

    # Largest row tile (multiple of 8) within the per-input tile budget.
    cap_rows = max(8, _round_down(tile_bytes_per_input // max(W * itemsize, 1), 8))
    if R < 8:
        TM = R                       # full-dim block (always legal), no fold
    else:
        TM = min(cap_rows, _round_down(R, 8))
    fold = (TM % 8 == 0)

    num_row_tiles = _cdiv(R, TM)
    splits = max(1, min(num_core_splits, num_row_tiles))
    tiles_per_split = _cdiv(num_row_tiles, splits)
    total_tiles = splits * tiles_per_split
    # Masking needed iff the tile grid over-covers the R valid rows (ragged
    # last tile and/or whole tiles beyond the end of the array).
    need_mask = (total_tiles * TM != R)

    if need_mask:
        # Clamp so no block index points past the array; over-range tiles just
        # re-read the last real tile and are fully masked in the kernel.
        def idx(p, j):
            return (jnp.minimum(p * tiles_per_split + j, num_row_tiles - 1), 0)
    else:
        def idx(p, j):
            return (p * tiles_per_split + j, 0)

    row_spec = pl.BlockSpec((TM, W), idx)
    acc_shape = (8, W) if fold else (1, W)

    kernel = _make_mse_kernel(TM, W, R, tiles_per_split, need_mask, fold)

    # Explicit scoped-VMEM limit from a conservative working-set estimate:
    #   3 inputs x 2 pipeline buffers + ~6 live f32 temporaries of the
    #   astype/diff/square/mask chain + accumulator + slack.
    tile_bytes = TM * W * itemsize
    f32_tile = TM * W * 4
    vmem_limit = 3 * 2 * tile_bytes + 6 * f32_tile + 8 * W * 4 + (4 << 20)
    vmem_limit = int(min(vmem_limit, 48 << 20))   # stays under v7x's 64 MiB/TC

    cost = pl.CostEstimate(
        flops=4 * N,                     # sub, square, weight-mul, accumulate
        transcendentals=0,
        bytes_accessed=3 * N * itemsize + splits * 4,
    )

    partials = pl.pallas_call(
        kernel,
        out_shape=jax.ShapeDtypeStruct((splits, 1), jnp.float32),
        grid_spec=pltpu.PrefetchScalarGridSpec(
            num_scalar_prefetch=0,
            grid=(splits, tiles_per_split),
            in_specs=[row_spec, row_spec, row_spec],
            out_specs=pl.BlockSpec(
                (1, 1), lambda p, j: (p, 0), memory_space=pltpu.SMEM
            ),
            scratch_shapes=[pltpu.VMEM(acc_shape, jnp.float32)],
        ),
        compiler_params=pltpu.CompilerParams(
            dimension_semantics=("parallel", "arbitrary"),
            vmem_limit_bytes=vmem_limit,
        ),
        cost_estimate=cost,
    )(prep(pred), prep(target), prep(ray_weights))

    # mean over the M original rows + loss_weight scaling outside the kernel
    # (no retrace if loss_weight is traced; combines per-core partial sums).
    return (jnp.float32(loss_weight) / jnp.float32(M)) * jnp.sum(partials)


def custom_mse_loss_ref(pred, target, ray_weights, loss_weight: float = 1.0):
    pred = pred.astype(jnp.float32)
    target = target.astype(jnp.float32)
    ray_weights = ray_weights.astype(jnp.float32)
    loss = (ray_weights * (pred - target) ** 2).sum(axis=-1).mean()
    return loss_weight * loss


if __name__ == "__main__":
    key = jax.random.PRNGKey(0)

    def run_case(shape, dtype, lw, tol):
        nonlocal_key = run_case.key
        k1, k2, k3, run_case.key = jax.random.split(nonlocal_key, 4)
        pred = jax.random.normal(k1, shape, dtype=dtype)
        target = jax.random.normal(k2, shape, dtype=dtype)
        ray_w = jax.random.uniform(k3, shape, dtype=dtype)
        out = jax.block_until_ready(custom_mse_loss(pred, target, ray_w, lw))
        ref = custom_mse_loss_ref(pred, target, ray_w, lw)
        assert jnp.allclose(out, ref, rtol=tol, atol=tol), (shape, dtype, out, ref)

    run_case.key = key

    # Case 1: (batch, num_rays, ray_dim) = (2, 8, 128) f32 — lane-dense, exact tiles.
    run_case((2, 8, 128), jnp.float32, 1.0, 1e-5)

    # Case 2: unaligned rows (M=15), D=64 — fallback layout + in-kernel tail mask.
    run_case((3, 5, 64), jnp.float32, 0.5, 1e-5)

    # Case 3: bf16 inputs streamed as bf16, f32 accumulation in-kernel.
    run_case((2, 8, 128), jnp.bfloat16, 1.0, 1e-4)

    # Case 4: lane-dense repack with ragged row tiles (M*D % 128 == 0, R % 8 != 0).
    run_case((2, 9, 192), jnp.float32, 2.0, 1e-5)

    # Case 5: tiny input (R < 8) exercising the no-fold path.
    run_case((1, 2, 64), jnp.float32, 1.0, 1e-5)

    print("KERNEL_OK")
</pallas_src>

<mosaic_0001>
module attributes {stable_mosaic.version = 11 : i64} {
  func.func @kernel(%arg0: i32, %arg1: i32, %arg2: memref<16x128xf32, #tpu.memory_space<vmem>>, %arg3: memref<16x128xf32, #tpu.memory_space<vmem>>, %arg4: memref<16x128xf32, #tpu.memory_space<vmem>>, %arg5: memref<1x1xf32, #tpu.memory_space<smem>>, %arg6: memref<8x128xf32, #tpu.memory_space<vmem>>) attributes {dimension_semantics = [#tpu.dimension_semantics<parallel>, #tpu.dimension_semantics<arbitrary>], iteration_bounds = array<i64: 1, 1>, scalar_prefetch = 0 : i64, scratch_operands = 1 : i64, tpu.core_type = #tpu.core_type<tc>, window_params = [{transform_indices = @transform_0, window_bounds = array<i64: 16, 128>}, {transform_indices = @transform_1, window_bounds = array<i64: 16, 128>}, {transform_indices = @transform_2, window_bounds = array<i64: 16, 128>}, {transform_indices = @transform_3, window_bounds = array<i64: 1, 1>}]} {
    %c0_i32 = arith.constant 0 : i32
    %0 = arith.cmpi eq, %arg1, %c0_i32 : i32
    %1 = arith.extui %0 : i1 to i32
    %c0_i32_0 = arith.constant 0 : i32
    %2 = arith.cmpi ne, %1, %c0_i32_0 : i32
    scf.if %2 {
      %cst_12 = arith.constant 0.000000e+00 : f32
      %17 = vector.broadcast %cst_12 : f32 to vector<8x128xf32>
      %c0_13 = arith.constant 0 : index
      %c0_14 = arith.constant 0 : index
      %18 = vector.load %arg6[%c0_13, %c0_14] : memref<8x128xf32, #tpu.memory_space<vmem>>, vector<8x128xf32>
      tpu.vector_store %arg6[%c0_13, %c0_14], %17 {strides = array<i32>} : memref<8x128xf32, #tpu.memory_space<vmem>>, vector<8x128xf32>,
    } else {
    }
    %c0 = arith.constant 0 : index
    %c0_1 = arith.constant 0 : index
    %3 = vector.load %arg2[%c0, %c0_1] : memref<16x128xf32, #tpu.memory_space<vmem>>, vector<16x128xf32>
    %c0_2 = arith.constant 0 : index
    %c0_3 = arith.constant 0 : index
    %4 = vector.load %arg3[%c0_2, %c0_3] : memref<16x128xf32, #tpu.memory_space<vmem>>, vector<16x128xf32>
    %c0_4 = arith.constant 0 : index
    %c0_5 = arith.constant 0 : index
    %5 = vector.load %arg4[%c0_4, %c0_5] : memref<16x128xf32, #tpu.memory_space<vmem>>, vector<16x128xf32>
    %6 = arith.subf %3, %4 : vector<16x128xf32>
    %7 = arith.mulf %5, %6 : vector<16x128xf32>
    %8 = arith.mulf %7, %6 : vector<16x128xf32>
    %c0_6 = arith.constant 0 : index
    %c0_7 = arith.constant 0 : index
    %9 = vector.load %arg6[%c0_6, %c0_7] : memref<8x128xf32, #tpu.memory_space<vmem>>, vector<8x128xf32>
    %10 = vector.shape_cast %8 : vector<16x128xf32> to vector<2x8x128xf32>
    %cst = arith.constant dense<0.000000e+00> : vector<8x128xf32>
    %11 = vector.multi_reduction <add>, %10, %cst [0] : vector<2x8x128xf32> to vector<8x128xf32>
    %12 = arith.addf %9, %11 : vector<8x128xf32>
    %c0_8 = arith.constant 0 : index
    %c0_9 = arith.constant 0 : index
    %13 = vector.load %arg6[%c0_8, %c0_9] : memref<8x128xf32, #tpu.memory_space<vmem>>, vector<8x128xf32>
    tpu.vector_store %arg6[%c0_8, %c0_9], %12 {strides = array<i32>} : memref<8x128xf32, #tpu.memory_space<vmem>>, vector<8x128xf32>,
    %c0_i32_10 = arith.constant 0 : i32
    %14 = arith.cmpi eq, %arg1, %c0_i32_10 : i32
    %15 = arith.extui %14 : i1 to i32
    %c0_i32_11 = arith.constant 0 : i32
    %16 = arith.cmpi ne, %15, %c0_i32_11 : i32
    scf.if %16 {
      %c0_12 = arith.constant 0 : index
      %c0_13 = arith.constant 0 : index
      %17 = vector.load %arg6[%c0_12, %c0_13] : memref<8x128xf32, #tpu.memory_space<vmem>>, vector<8x128xf32>
      %18 = vector.shape_cast %17 : vector<8x128xf32> to vector<1x8x128xf32>
      %cst_14 = arith.constant dense<0.000000e+00> : vector<1xf32>
      %19 = vector.multi_reduction <add>, %18, %cst_14 [1, 2] : vector<1x8x128xf32> to vector<1xf32>
      %20 = vector.shape_cast %19 : vector<1xf32> to vector<1x1x1xf32>
      %21 = vector.extract %20[0, 0, 0] : f32 from vector<1x1x1xf32>
      %c0_15 = arith.constant 0 : index
      %c0_16 = arith.constant 0 : index
      %22 = memref.load %arg5[%c0_15, %c0_16] : memref<1x1xf32, #tpu.memory_space<smem>>
      memref.store %21, %arg5[%c0_15, %c0_16] : memref<1x1xf32, #tpu.memory_space<smem>>
    } else {
    }
    return
  }
  func.func @transform_0(%arg0: i32, %arg1: i32) -> (i32, i32) {
    %c1_i32 = arith.constant 1 : i32
    %0 = arith.muli %arg0, %c1_i32 : i32
    %1 = arith.addi %0, %arg1 : i32
    %c0_i32 = arith.constant 0 : i32
    %c0_i32_0 = arith.constant 0 : i32
    return %1, %c0_i32 : i32, i32
  }
  func.func @transform_1(%arg0: i32, %arg1: i32) -> (i32, i32) {
    %c1_i32 = arith.constant 1 : i32
    %0 = arith.muli %arg0, %c1_i32 : i32
    %1 = arith.addi %0, %arg1 : i32
    %c0_i32 = arith.constant 0 : i32
    %c0_i32_0 = arith.constant 0 : i32
    return %1, %c0_i32 : i32, i32
  }
  func.func @transform_2(%arg0: i32, %arg1: i32) -> (i32, i32) {
    %c1_i32 = arith.constant 1 : i32
    %0 = arith.muli %arg0, %c1_i32 : i32
    %1 = arith.addi %0, %arg1 : i32
    %c0_i32 = arith.constant 0 : i32
    %c0_i32_0 = arith.constant 0 : i32
    return %1, %c0_i32 : i32, i32
  }
  func.func @transform_3(%arg0: i32, %arg1: i32) -> (i32, i32) {
    %c0_i32 = arith.constant 0 : i32
    %c0_i32_0 = arith.constant 0 : i32
    return %arg0, %c0_i32 : i32, i32
  }
}

</mosaic_0001>

<bundles_post_ra>
// kernel: tpu_custom_call.1
= control target key start
LH: loop header
LB: loop body
LE: loop exit
PB: predicated region body
PF: predicated region fallthrough
CT: control target
= control target key end

     0   :  { %8 = vsyncpa [#allocation4], 0  ;;  %s269_s0 = inlined_call_operand.hbm [shape: f32[16,128], index: 0, kind: input, shape index: {}]   ;;  %s270_s1 = inlined_call_operand.hbm [shape: f32[16,128], index: 1, kind: input, shape index: {}]   ;;  %s271_s2 = inlined_call_operand.hbm [shape: f32[16,128], index: 2, kind: input, shape index: {}]   ;;  %s272_s3 = inlined_call_operand.hbm [shape: f32[1,1], index: 3, kind: output, shape index: {}]  }
   0x1   :  { %9 = vsyncpa [#allocation7], 0 }
   0x2   :  { %10 = vsyncpa [#allocation5], 0  ;;  %s36_s14 = sshll.u32 %s270_s1, 4  ;;  %s231_s15 = smov [#allocation6]   ;;  %s37_s14 = int_to_ptr.hbm [resolvable:$true] %s36_s14 }
   0x3   :  { %s38_s16 = sshll.u32 %s231_s15, 4  ;;  %s19_s19 = sshll.u32 %s269_s0, 4  ;;  %s39_s16 = int_to_ptr.vmem [resolvable:$true] %s38_s16  ;;  %s20_s19 = int_to_ptr.hbm [resolvable:$true] %s19_s19 }
   0x4   :  { %s232_s20 = smov 128   ;;  %s233_s21 = smov 8  }
   0x5   :  { %44 = dma.hbm_to_vmem [thread:$0]  %s37_s14, 256, %s39_s16, [#allocation7], %s232_s20, %s232_s20, %s233_s21  }
   0x6   :  { %s234_s22 = smov [#allocation3]   ;;  %s53_s26 = sshll.u32 %s271_s2, 4  ;;  %s54_s26 = int_to_ptr.hbm [resolvable:$true] %s53_s26 }
   0x7   :  { %s21_s23 = sshll.u32 %s234_s22, 4  ;;  %s235_s1 = smov [#allocation8]   ;;  %s22_s23 = int_to_ptr.vmem [resolvable:$true] %s21_s23 }
   0x8   :  { %27 = dma.hbm_to_vmem [thread:$0]  %s20_s19, 256, %s22_s23, [#allocation4], %s232_s20, %s232_s20, %s233_s21  }
   0x9   :  { %s55_s27 = sshll.u32 %s235_s1, 4  ;;  %s56_s27 = int_to_ptr.vmem [resolvable:$true] %s55_s27 }
   0xa   :  { %61 = dma.hbm_to_vmem [thread:$0]  %s54_s26, 256, %s56_s27, [#allocation7], %s232_s20, %s232_s20, %s233_s21  }
   0xb   :  { %225 = dma.done.wait [#allocation4], 256  }
   0xc   :  { %226 = vsyncadd [#allocation4], 4294967040 }
   0xd   :  { %227 = dma.done.wait [#allocation7], 512  }
   0xe   :  { %228 = vsyncadd [#allocation7], 4294966784  ;;  %v85_v0 = vld [vmem:[#allocation3] sm:$0xff]  ;;  %v86_v1 = vld [vmem:[#allocation3 + $0x8] sm:$0xff]  ;;  %s121_s28 = sshll.u32 %s272_s3, 4  ;;  %s236_s30 = smov [#allocation9]   ;;  %s122_s28 = int_to_ptr.hbm [resolvable:$true] %s121_s28 }
   0xf   :  { %v87_v2 = vld [vmem:[#allocation6] sm:$0xff]  ;;  %v88_v3 = vld [vmem:[#allocation6 + $0x8] sm:$0xff]  ;;  %v89_v4 = vld [vmem:[#allocation8] sm:$0xff] }
  0x10   :  { %v90_v5 = vld [vmem:[#allocation8 + $0x8] sm:$0xff]  ;;  %v91_v6 = vsub.f32 %v85_v0, %v87_v2  ;;  %v92_v7 = vsub.f32 %v86_v1, %v88_v3 }
  0x12   :  { %v93_v8 = vmul.f32 %v91_v6, %v89_v4  ;;  %v94_v9 = vmul.f32 %v92_v7, %v90_v5 }
  0x14   :  { %v95_v10 = vmul.f32 %v93_v8, %v91_v6  ;;  %v96_v11 = vmul.f32 %v94_v9, %v92_v7 }
  0x16   :  { %v98_v12 = vadd.f32 %v96_v11, %v95_v10 }
  0x18   :  { %105 = vadd.xlane.f32.xlu0 %v98_v12 }
  0x8b   :  { %v106_v13 = vpop.xlane.xlu0 %105 }
  0x8c   :  { %v107_v14 = vrot.slane %v106_v13, 4 }
  0x8e   :  { %v108_v15 = vadd.f32 %v107_v14, %v106_v13 }
  0x90   :  { %v109_v16 = vrot.slane %v108_v15, 2 }
  0x92   :  { %v110_v17 = vadd.f32 %v109_v16, %v108_v15 }
  0x94   :  { %v111_v18 = vrot.slane %v110_v17, 1 }
  0x96   :  { %v112_v19 = vadd.f32 %v111_v18, %v110_v17 }
  0x98   :  { %133 = vpush %v112_v19 }
  0xc9   :  { %s134_s29 = spop %133 }
  0xca   :  { %115 = sst [smem:[#allocation9]] %s134_s29 }
  0xcb   :  { %124 = dma.smem_to_hbm %s236_s30, 16, %s122_s28, [#allocation5]  }
  0xcc   :  { %229 = dma.done.wait [#allocation5], 16  }
  0xcd   :  { %230 = vsyncadd [#allocation5], 4294967280 }
  0xce   :  { %129 = sfence }
  0xcf   :  { %130 = vsyncpa [#allocation4], 1 }
  0xd0   :  { %131 = vsyncpa [#allocation7], 1 }
  0xd1   :  { %132 = vsyncpa [#allocation5], 1 }

</bundles_post_ra>
